<compile_context>
chip_gen: v7x
topology: tpu7x:2x2x1
jax: 0.10.0
libtpu: 0.0.40
codegen_flags: <defaults>
</compile_context>

<pallas_src>
import functools

import jax
import jax.numpy as jnp
from jax.experimental import pallas as pl
from jax.experimental.pallas import tpu as pltpu

LANE = 128
HIDDEN = 128


def _round_up(x, m):
    return ((x + m - 1) // m) * m


# ---------------------------------------------------------------------------
# Kernel
# ---------------------------------------------------------------------------
def dqn_kernel(x_ref, w1_ref, b1_ref, w2_ref, b2_ref, w3_ref, b3_ref, o_ref):
    # Cast activations to the weights' compute dtype (bf16) right before each
    # MXU matmul; accumulate in f32; do bias + ReLU in f32 (v5e-safe).
    x = x_ref[...].astype(w1_ref.dtype)

    h1 = jnp.dot(x, w1_ref[...], preferred_element_type=jnp.float32)
    h1 = jnp.maximum(h1 + b1_ref[...], 0.0)

    h2 = jnp.dot(h1.astype(w2_ref.dtype), w2_ref[...],
                 preferred_element_type=jnp.float32)
    h2 = jnp.maximum(h2 + b2_ref[...], 0.0)

    h3 = jnp.dot(h2.astype(w3_ref.dtype), w3_ref[...],
                 preferred_element_type=jnp.float32)
    o_ref[...] = (h3 + b3_ref[...]).astype(o_ref.dtype)


# ---------------------------------------------------------------------------
# One-time parameter preparation (kernel layout). Call once, reuse every step.
# ---------------------------------------------------------------------------
def prepare_params(params, compute_dtype=jnp.bfloat16):
    """PyTorch convention (w: (out,in), b: (out,)) -> kernel layout:
    weights (in,out) in `compute_dtype`, biases (1,out) f32, layer-3 padded to
    a lane-dense 128-wide output."""
    n_actions = params["w3"].shape[0]
    n_act_pad = _round_up(n_actions, LANE)

    w1 = params["w1"].T.astype(compute_dtype)                      # (n_obs, 128)
    w2 = params["w2"].T.astype(compute_dtype)                      # (128, 128)
    w3 = jnp.zeros((HIDDEN, n_act_pad), compute_dtype)
    w3 = w3.at[:, :n_actions].set(params["w3"].T.astype(compute_dtype))

    b1 = params["b1"].reshape(1, -1).astype(jnp.float32)           # (1, 128)
    b2 = params["b2"].reshape(1, -1).astype(jnp.float32)           # (1, 128)
    b3 = jnp.zeros((1, n_act_pad), jnp.float32)
    b3 = b3.at[:, :n_actions].set(params["b3"].astype(jnp.float32))

    return {"w1": w1, "b1": b1, "w2": w2, "b2": b2, "w3": w3, "b3": b3,
            "n_actions": n_actions}


# ---------------------------------------------------------------------------
# Forward wrapper
# ---------------------------------------------------------------------------
def dqn_forward(x, kparams, *, block_b=128):
    """x: (B, n_observations) float32. kparams: output of prepare_params."""
    B, n_obs = x.shape
    n_actions = kparams["n_actions"]
    n_act_pad = kparams["w3"].shape[1]

    # Pick the batch block: multiple of 8 sublanes, capped by the (padded) B.
    block_b = min(block_b, _round_up(B, 8))
    block_b = _round_up(block_b, 8)
    B_pad = _round_up(B, block_b)
    if B_pad != B:
        x = jnp.pad(x, ((0, B_pad - B), (0, 0)))
    grid = (B_pad // block_b,)

    flops = 2 * B_pad * (n_obs * HIDDEN + HIDDEN * HIDDEN + HIDDEN * n_act_pad)
    bytes_accessed = (
        x.size * x.dtype.itemsize
        + sum(kparams[k].size * kparams[k].dtype.itemsize
              for k in ("w1", "b1", "w2", "b2", "w3", "b3"))
        + B_pad * n_act_pad * 4)
    cost = pl.CostEstimate(flops=flops, transcendentals=0,
                           bytes_accessed=bytes_accessed)

    out = pl.pallas_call(
        dqn_kernel,
        out_shape=jax.ShapeDtypeStruct((B_pad, n_act_pad), jnp.float32),
        grid_spec=pltpu.PrefetchScalarGridSpec(
            num_scalar_prefetch=0,
            grid=grid,
            in_specs=[
                # x: tiled over batch
                pl.BlockSpec((block_b, n_obs), lambda i: (i, 0)),
                # weights / biases: whole-array, VMEM-resident across the grid
                pl.BlockSpec((n_obs, HIDDEN), lambda i: (0, 0)),
                pl.BlockSpec((1, HIDDEN), lambda i: (0, 0)),
                pl.BlockSpec((HIDDEN, HIDDEN), lambda i: (0, 0)),
                pl.BlockSpec((1, HIDDEN), lambda i: (0, 0)),
                pl.BlockSpec((HIDDEN, n_act_pad), lambda i: (0, 0)),
                pl.BlockSpec((1, n_act_pad), lambda i: (0, 0)),
            ],
            out_specs=pl.BlockSpec((block_b, n_act_pad), lambda i: (i, 0)),
        ),
        compiler_params=pltpu.CompilerParams(
            dimension_semantics=("parallel",)),
        cost_estimate=cost,
    )(x, kparams["w1"], kparams["b1"], kparams["w2"], kparams["b2"],
      kparams["w3"], kparams["b3"])

    # Strip batch padding and the lane padding of the final layer.
    return out[:B, :n_actions]


# ---------------------------------------------------------------------------
# Init + reference (PyTorch nn.Linear-style init, f32 master weights)
# ---------------------------------------------------------------------------
def init_params(key, n_observations, n_actions):
    def linear(key, fan_in, fan_out):
        kw, kb = jax.random.split(key)
        bound = 1.0 / jnp.sqrt(fan_in)
        w = jax.random.uniform(kw, (fan_out, fan_in), jnp.float32, -bound, bound)
        b = jax.random.uniform(kb, (fan_out,), jnp.float32, -bound, bound)
        return w, b

    k1, k2, k3 = jax.random.split(key, 3)
    w1, b1 = linear(k1, n_observations, HIDDEN)
    w2, b2 = linear(k2, HIDDEN, HIDDEN)
    w3, b3 = linear(k3, HIDDEN, n_actions)
    return {"w1": w1, "b1": b1, "w2": w2, "b2": b2, "w3": w3, "b3": b3}


def dqn_reference(x, params, compute_dtype=jnp.bfloat16):
    """Pure-JAX reference matching the kernel's numerics (bf16 matmul inputs,
    f32 accumulation, f32 bias/ReLU)."""
    w1 = params["w1"].T.astype(compute_dtype)
    w2 = params["w2"].T.astype(compute_dtype)
    w3 = params["w3"].T.astype(compute_dtype)
    h = jnp.dot(x.astype(compute_dtype), w1, preferred_element_type=jnp.float32)
    h = jnp.maximum(h + params["b1"], 0.0)
    h = jnp.dot(h.astype(compute_dtype), w2, preferred_element_type=jnp.float32)
    h = jnp.maximum(h + params["b2"], 0.0)
    h = jnp.dot(h.astype(compute_dtype), w3, preferred_element_type=jnp.float32)
    return h + params["b3"]


if __name__ == "__main__":
    key = jax.random.PRNGKey(0)
    n_observations, n_actions = 4, 2

    kp, kx1, kx2 = jax.random.split(key, 3)
    params = init_params(kp, n_observations, n_actions)
    kparams = prepare_params(params)  # one-time layout conversion

    ok = True
    # Case 1: batched forward (exercises a 2-block parallel grid at block=128).
    x1 = jax.random.normal(kx1, (256, n_observations), jnp.float32)
    out1 = jax.block_until_ready(dqn_forward(x1, kparams))
    ref1 = dqn_reference(x1, params)
    ok &= out1.shape == (256, n_actions)
    ok &= bool(jnp.allclose(out1, ref1, atol=2e-2, rtol=2e-2))

    # Case 2: small, non-multiple-of-8 batch (exercises batch padding path).
    x2 = jax.random.normal(kx2, (20, n_observations), jnp.float32)
    out2 = jax.block_until_ready(dqn_forward(x2, kparams))
    ref2 = dqn_reference(x2, params)
    ok &= out2.shape == (20, n_actions)
    ok &= bool(jnp.allclose(out2, ref2, atol=2e-2, rtol=2e-2))

    assert ok, "Pallas DQN kernel does not match reference"
    print("KERNEL_OK")
</pallas_src>

<mosaic_0001>
module attributes {stable_mosaic.version = 11 : i64} {
  func.func @dqn_kernel(%arg0: i32, %arg1: memref<128x4xf32, #tpu.memory_space<vmem>>, %arg2: memref<4x128xbf16, #tpu.memory_space<vmem>>, %arg3: memref<1x128xf32, #tpu.memory_space<vmem>>, %arg4: memref<128x128xbf16, #tpu.memory_space<vmem>>, %arg5: memref<1x128xf32, #tpu.memory_space<vmem>>, %arg6: memref<128x128xbf16, #tpu.memory_space<vmem>>, %arg7: memref<1x128xf32, #tpu.memory_space<vmem>>, %arg8: memref<128x128xf32, #tpu.memory_space<vmem>>) attributes {dimension_semantics = [#tpu.dimension_semantics<parallel>], iteration_bounds = array<i64: 2>, scalar_prefetch = 0 : i64, scratch_operands = 0 : i64, tpu.core_type = #tpu.core_type<tc>, window_params = [{transform_indices = @transform_0, window_bounds = array<i64: 128, 4>}, {pipeline_mode = #tpu.pipeline_mode<synchronous>, transform_indices = @transform_1, window_bounds = array<i64: 4, 128>}, {pipeline_mode = #tpu.pipeline_mode<synchronous>, transform_indices = @transform_2, window_bounds = array<i64: 1, 128>}, {pipeline_mode = #tpu.pipeline_mode<synchronous>, transform_indices = @transform_3, window_bounds = array<i64: 128, 128>}, {pipeline_mode = #tpu.pipeline_mode<synchronous>, transform_indices = @transform_4, window_bounds = array<i64: 1, 128>}, {pipeline_mode = #tpu.pipeline_mode<synchronous>, transform_indices = @transform_5, window_bounds = array<i64: 128, 128>}, {pipeline_mode = #tpu.pipeline_mode<synchronous>, transform_indices = @transform_6, window_bounds = array<i64: 1, 128>}, {transform_indices = @transform_7, window_bounds = array<i64: 128, 128>}]} {
    %c0 = arith.constant 0 : index
    %c0_0 = arith.constant 0 : index
    %0 = vector.load %arg1[%c0, %c0_0] : memref<128x4xf32, #tpu.memory_space<vmem>>, vector<128x4xf32>
    %1 = arith.truncf %0 : vector<128x4xf32> to vector<128x4xbf16>
    %c0_1 = arith.constant 0 : index
    %c0_2 = arith.constant 0 : index
    %2 = vector.load %arg2[%c0_1, %c0_2] : memref<4x128xbf16, #tpu.memory_space<vmem>>, vector<4x128xbf16>
    %cst = arith.constant dense<0.000000e+00> : vector<128x128xf32>
    %3 = tpu.matmul %1, %2, %cst {dimension_numbers = #tpu.dot_dimension_numbers<[1], [0], [0], [1], [0, 0, 1, 1], [], []>} : vector<128x4xbf16>, vector<4x128xbf16>, vector<128x128xf32> -> vector<128x128xf32>
    %c0_3 = arith.constant 0 : index
    %c0_4 = arith.constant 0 : index
    %4 = vector.load %arg3[%c0_3, %c0_4] : memref<1x128xf32, #tpu.memory_space<vmem>>, vector<1x128xf32>
    %5 = vector.broadcast %4 : vector<1x128xf32> to vector<128x128xf32>
    %6 = arith.addf %3, %5 : vector<128x128xf32>
    %cst_5 = arith.constant 0.000000e+00 : f32
    %7 = vector.broadcast %cst_5 : f32 to vector<128x128xf32>
    %8 = arith.maximumf %6, %7 : vector<128x128xf32>
    %9 = arith.truncf %8 : vector<128x128xf32> to vector<128x128xbf16>
    %c0_6 = arith.constant 0 : index
    %c0_7 = arith.constant 0 : index
    %10 = vector.load %arg4[%c0_6, %c0_7] : memref<128x128xbf16, #tpu.memory_space<vmem>>, vector<128x128xbf16>
    %cst_8 = arith.constant dense<0.000000e+00> : vector<128x128xf32>
    %11 = tpu.matmul %9, %10, %cst_8 {dimension_numbers = #tpu.dot_dimension_numbers<[1], [0], [0], [1], [0, 0, 1, 1], [], []>} : vector<128x128xbf16>, vector<128x128xbf16>, vector<128x128xf32> -> vector<128x128xf32>
    %c0_9 = arith.constant 0 : index
    %c0_10 = arith.constant 0 : index
    %12 = vector.load %arg5[%c0_9, %c0_10] : memref<1x128xf32, #tpu.memory_space<vmem>>, vector<1x128xf32>
    %13 = vector.broadcast %12 : vector<1x128xf32> to vector<128x128xf32>
    %14 = arith.addf %11, %13 : vector<128x128xf32>
    %cst_11 = arith.constant 0.000000e+00 : f32
    %15 = vector.broadcast %cst_11 : f32 to vector<128x128xf32>
    %16 = arith.maximumf %14, %15 : vector<128x128xf32>
    %17 = arith.truncf %16 : vector<128x128xf32> to vector<128x128xbf16>
    %c0_12 = arith.constant 0 : index
    %c0_13 = arith.constant 0 : index
    %18 = vector.load %arg6[%c0_12, %c0_13] : memref<128x128xbf16, #tpu.memory_space<vmem>>, vector<128x128xbf16>
    %cst_14 = arith.constant dense<0.000000e+00> : vector<128x128xf32>
    %19 = tpu.matmul %17, %18, %cst_14 {dimension_numbers = #tpu.dot_dimension_numbers<[1], [0], [0], [1], [0, 0, 1, 1], [], []>} : vector<128x128xbf16>, vector<128x128xbf16>, vector<128x128xf32> -> vector<128x128xf32>
    %c0_15 = arith.constant 0 : index
    %c0_16 = arith.constant 0 : index
    %20 = vector.load %arg7[%c0_15, %c0_16] : memref<1x128xf32, #tpu.memory_space<vmem>>, vector<1x128xf32>
    %21 = vector.broadcast %20 : vector<1x128xf32> to vector<128x128xf32>
    %22 = arith.addf %19, %21 : vector<128x128xf32>
    %c0_17 = arith.constant 0 : index
    %c0_18 = arith.constant 0 : index
    %23 = vector.load %arg8[%c0_17, %c0_18] : memref<128x128xf32, #tpu.memory_space<vmem>>, vector<128x128xf32>
    tpu.vector_store %arg8[%c0_17, %c0_18], %22 {strides = array<i32>} : memref<128x128xf32, #tpu.memory_space<vmem>>, vector<128x128xf32>,
    return
  }
  func.func @transform_0(%arg0: i32) -> (i32, i32) {
    %c0_i32 = arith.constant 0 : i32
    %c0_i32_0 = arith.constant 0 : i32
    return %arg0, %c0_i32 : i32, i32
  }
  func.func @transform_1(%arg0: i32) -> (i32, i32) {
    %c0_i32 = arith.constant 0 : i32
    %c0_i32_0 = arith.constant 0 : i32
    %c0_i32_1 = arith.constant 0 : i32
    return %c0_i32, %c0_i32_0 : i32, i32
  }
  func.func @transform_2(%arg0: i32) -> (i32, i32) {
    %c0_i32 = arith.constant 0 : i32
    %c0_i32_0 = arith.constant 0 : i32
    %c0_i32_1 = arith.constant 0 : i32
    return %c0_i32, %c0_i32_0 : i32, i32
  }
  func.func @transform_3(%arg0: i32) -> (i32, i32) {
    %c0_i32 = arith.constant 0 : i32
    %c0_i32_0 = arith.constant 0 : i32
    %c0_i32_1 = arith.constant 0 : i32
    return %c0_i32, %c0_i32_0 : i32, i32
  }
  func.func @transform_4(%arg0: i32) -> (i32, i32) {
    %c0_i32 = arith.constant 0 : i32
    %c0_i32_0 = arith.constant 0 : i32
    %c0_i32_1 = arith.constant 0 : i32
    return %c0_i32, %c0_i32_0 : i32, i32
  }
  func.func @transform_5(%arg0: i32) -> (i32, i32) {
    %c0_i32 = arith.constant 0 : i32
    %c0_i32_0 = arith.constant 0 : i32
    %c0_i32_1 = arith.constant 0 : i32
    return %c0_i32, %c0_i32_0 : i32, i32
  }
  func.func @transform_6(%arg0: i32) -> (i32, i32) {
    %c0_i32 = arith.constant 0 : i32
    %c0_i32_0 = arith.constant 0 : i32
    %c0_i32_1 = arith.constant 0 : i32
    return %c0_i32, %c0_i32_0 : i32, i32
  }
  func.func @transform_7(%arg0: i32) -> (i32, i32) {
    %c0_i32 = arith.constant 0 : i32
    %c0_i32_0 = arith.constant 0 : i32
    return %arg0, %c0_i32 : i32, i32
  }
}

</mosaic_0001>

<bundles_post_ra>
// kernel: tpu_custom_call.1
= control target key start
LH: loop header
LB: loop body
LE: loop exit
PB: predicated region body
PF: predicated region fallthrough
CT: control target
= control target key end

     0   :  { %12 = vsyncpa [#allocation3], 0  ;;  %s1454_s0 = inlined_call_operand.vmem [shape: f32[256,4], index: 0, kind: input, shape index: {}]   ;;  %s1455_s1 = inlined_call_operand.vmem [shape: bf16[4,128], index: 1, kind: input, shape index: {}]   ;;  %s1456_s2 = inlined_call_operand.vmem [shape: f32[1,128], index: 2, kind: input, shape index: {}]   ;;  %s1457_s3 = inlined_call_operand.vmem [shape: bf16[128,128], index: 3, kind: input, shape index: {}]   ;;  %s1458_s4 = inlined_call_operand.vmem [shape: f32[1,128], index: 4, kind: input, shape index: {}]   ;;  %s1459_s5 = inlined_call_operand.vmem [shape: bf16[128,128], index: 5, kind: input, shape index: {}]   ;;  %s1460_s6 = inlined_call_operand.vmem [shape: f32[1,128], index: 6, kind: input, shape index: {}]   ;;  %s1461_s7 = inlined_call_operand.hbm [shape: f32[256,128], index: 7, kind: output, shape index: {}]  }
   0x1   :  { %14 = vsyncpa [#allocation3 + $0x1], 0  ;;  %s1243_s24 = smov 0   ;;  %s1245_s25 = smov 0  }
   0x2   :  { %s1247_s26 = smov 0   ;;  %s1249_s27 = smov 0  }
   0x3 LB: > { %s1264_s28 = sadd.s32 4294967295, %s1198_s27   ;;  %s915_s29 = sadd.s32 4294967294, %s1198_s27   ;;  %s1198_s27 = sphi %s1249_s27, %s1467_s27   ;;  %s1194_s26 = sphi %s1247_s26, %s1466_s26   ;;  %s1190_s25 = sphi %s1245_s25, %s1465_s25   ;;  %s1186_s24 = sphi %s1243_s24, %s1464_s24  }
   0x4   : > { %s1268_s30 = sadd.s32 1, %s1198_s27   ;;  %s179_s8 = sadd.s32 1, %s1194_s26 }
   0x5   : > { %s176_s9 = ssub.s32 %s1198_s27, %s1268_s30  ;;  %p189_p0 = scmp.ne.s32.totalorder %s1194_s26, %s1190_s25 }
   0x6   : > { %p177_p1 = scmp.eq.s32.totalorder %s176_s9, 0  ;;  %p190_p2 = scmp.eq.s32.totalorder %s1264_s28, 1 }
   0x7   : > { %p195_p3 = scmp.ne.s32.totalorder %s1190_s25, %s1186_s24  ;;  %p196_p4 = scmp.eq.s32.totalorder %s915_s29, 1 }
   0x8   : > { %s1279_s10 = scalar_select %p177_p1, %s1194_s26, %s179_s8  }
   0x9   : > { %p1281_p5 = por %p190_p2, %p189_p0  ;;  %p1285_p6 = por %p196_p4, %p195_p3 }
   0xa   : > { %p918_p7 = scmp.ge.s32.totalorder %s1198_s27, 1  ;;  %p241_p8 = scmp.lt.s32.totalorder %s1198_s27, 3 }
   0xc   : > { %p242_p9 = pnand %p918_p7, %p241_p8 }
   0xd   : > { %v305_v0 = vld [vmem:[%s1455_s1] sm:$0x3] (!%p242_p9)  ;;  %vm338_vm0 = vcmask (!%p242_p9), 1041408   ;;  %s920_s15 = sshll.u32 (!%p242_p9), %s1264_s28, 4  ;;  %v1121_v3 = vld [vmem:[%s1457_s3 + $0x8] sm:$0xff] (!%p242_p9)   ;;  %v1122_v4 = vld [vmem:[%s1457_s3 + $0x10] sm:$0xff] (!%p242_p9)  }
   0xe   : > { %245 = sbr.rel (%p242_p9) target bundleno = 728 (0x2d8), region = 48  ;;  %v1120_v1 = vld [vmem:[%s1457_s3] sm:$0xff] (!%p242_p9)   ;;  %1078 = vmatprep.subr.msk.bf16.mxu0 (!%p242_p9), %vm338_vm0, %v305_v0  ;;  %v340_v2 = vsel (!%p242_p9), %vm338_vm0, %v305_v0, 0  ;;  %p274_p10 = scmp.lt.s32.totalorder (!%p242_p9), %s920_s15, 31  ;;  %v1123_v5 = vld [vmem:[%s1457_s3 + $0x18] sm:$0xff] (!%p242_p9)   ;;  %vm313_vm1 = vcmask (!%p242_p9), 31744  }
   0xf   : > { %997 = vmatpush3.bf16.msra.mxu0 (!%p242_p9), %v340_v2  ;;  %1014 = vmatprep.subr.bf16.mxu1 (!%p242_p9), %v1120_v1  ;;  %v1124_v15 = vld [vmem:[%s1457_s3 + $0x20] sm:$0xff] (!%p242_p9)   ;;  %v1125_v20 = vld [vmem:[%s1457_s3 + $0x28] sm:$0xff] (!%p242_p9)   ;;  %v1126_v32 = vld [vmem:[%s1457_s3 + $0x30] sm:$0xff] (!%p242_p9)   ;;  %s270_s14 = sand.u32 (!%p242_p9), 1, %s1190_s25   ;;  %s954_s19 = sshll.u32 (!%p242_p9), %s1264_s28, 11 }
  0x10   : > { %1015 = vmatpush3.bf16.msra.mxu1 (!%p242_p9), %v1120_v1  ;;  %v1127_v33 = vld [vmem:[%s1457_s3 + $0x38] sm:$0xff] (!%p242_p9)   ;;  %v1128_v34 = vld [vmem:[%s1459_s5] sm:$0xff] (!%p242_p9)   ;;  %v1129_v35 = vld [vmem:[%s1459_s5 + $0x8] sm:$0xff] (!%p242_p9)   ;;  %s1404_s23 = scalar_lea.hbm (!%p242_p9), %s1461_s7, %s954_s19  ;;  %s1413_s28 = scalar_lea.sflag (!%p242_p9), [#allocation3], %s270_s14 }
  0x11   : > { %1016 = vmatprep.subr.bf16.mxu1 (!%p242_p9), %v1121_v3  ;;  %1046 = vmatprep.subr.bf16.mxu0 (!%p242_p9), %v1128_v34  ;;  %v1130_v36 = vld [vmem:[%s1459_s5 + $0x10] sm:$0xff] (!%p242_p9)   ;;  %v1131_v37 = vld [vmem:[%s1459_s5 + $0x18] sm:$0xff] (!%p242_p9)   ;;  %v1132_v38 = vld [vmem:[%s1459_s5 + $0x20] sm:$0xff] (!%p242_p9)  }
  0x12   : > { %v1133_v39 = vld [vmem:[%s1459_s5 + $0x28] sm:$0xff] (!%p242_p9)   ;;  %v922_v40 = vld [vmem:[%s1456_s2] ss:$0 sm:$0xff] (!%p242_p9) }
  0x14   : > { %1017 = vmatpush3.bf16.msra.mxu1 (!%p242_p9), %v1121_v3 }
  0x15   : > { %s1469_s15 = smov (!%p274_p10, %s920_s15), 31  ;;  %1018 = vmatprep.subr.bf16.mxu1 %v1122_v4 }
  0x16   : > { %s921_s22 = sshll.u32 %s1469_s15, 3  ;;  %s919_s15 = sshll.u32 %s270_s14, 7 }
  0x17   : > { %s1307_s8 = scalar_lea.vmem %s1454_s0, %s921_s22  ;;  %s1384_s18 = scalar_lea.vmem [#allocation2], %s919_s15 }
  0x18   : > { %v281_v6 = vld [vmem:[%s1307_s8] sm:$0xff]  ;;  %v282_v7 = vld [vmem:[%s1307_s8 + $0x8] sm:$0xff]  ;;  %v283_v8 = vld [vmem:[%s1307_s8 + $0x10] sm:$0xff]  ;;  %1019 = vmatpush3.bf16.msra.mxu1 %v1122_v4  ;;  %s853_s20 = sshll.u32 %s1384_s18, 4  ;;  %s1406_s20 = int_to_ptr.vmem [resolvable:$true] %s853_s20 }
  0x19   : > { %v297_v9 = vpack.c.bf16 %v282_v7, %v281_v6  ;;  %v284_v10 = vld [vmem:[%s1307_s8 + $0x18] sm:$0xff]  ;;  %v285_v11 = vld [vmem:[%s1307_s8 + $0x20] sm:$0xff]  ;;  %v286_v12 = vld [vmem:[%s1307_s8 + $0x28] sm:$0xff]  ;;  %1020 = vmatprep.subr.bf16.mxu1 %v1123_v5  ;;  %s1136_s29 = scalar_lea.vmem %s1406_s20, 2048 }
  0x1a   : > { %v298_v13 = vpack.c.bf16 %v284_v10, %v283_v8  ;;  %v299_v14 = vpack.c.bf16 %v286_v12, %v285_v11  ;;  %v287_v16 = vld [vmem:[%s1307_s8 + $0x30] sm:$0xff]  ;;  %v288_v17 = vld [vmem:[%s1307_s8 + $0x38] sm:$0xff]  ;;  %v289_v18 = vld [vmem:[%s1307_s8 + $0x40] sm:$0xff]  ;;  %p1137_p11 = scmp.ne.s32.totalorder %s1406_s20, %s1136_s29 }
  0x1b   : > { %998 = vmatprep.mubr.msk.bf16.mxu0 %vm313_vm1, %v297_v9  ;;  %v290_v19 = vld [vmem:[%s1307_s8 + $0x48] sm:$0xff]  ;;  %v300_v21 = vpack.c.bf16 %v288_v17, %v287_v16  ;;  %v291_v23 = vld [vmem:[%s1307_s8 + $0x50] sm:$0xff]  ;;  %v292_v24 = vld [vmem:[%s1307_s8 + $0x58] sm:$0xff] }
  0x1c   : > { %999 = vmatmul.mubr.msk.bf16.vlgmr.msra.gmra.mrb[0].mxu0 %vm313_vm1, %v298_v13  ;;  %1021 = vmatpush3.bf16.msra.mxu1 %v1123_v5  ;;  %v301_v22 = vpack.c.bf16 %v290_v19, %v289_v18  ;;  %v293_v25 = vld [vmem:[%s1307_s8 + $0x60] sm:$0xff]  ;;  %v294_v26 = vld [vmem:[%s1307_s8 + $0x68] sm:$0xff]  ;;  %v302_v27 = vpack.c.bf16 %v292_v24, %v291_v23  ;;  %v295_v29 = vld [vmem:[%s1307_s8 + $0x70] sm:$0xff]  ;;  %p1138_p12 = pnand %p1137_p11, %p1281_p5 }
  0x1d   : > { %1002 = vmatprep.mubr.msk.bf16.mxu0 %vm313_vm1, %v299_v14  ;;  %1022 = vmatprep.subr.bf16.mxu1 %v1124_v15  ;;  %v303_v28 = vpack.c.bf16 %v294_v26, %v293_v25  ;;  %v296_v30 = vld [vmem:[%s1307_s8 + $0x78] sm:$0xff]  ;;  %s1200_s8 = smov [#allocation2]  }
  0x1e   : > { %v304_v31 = vpack.c.bf16 %v296_v30, %v295_v29  ;;  %1047 = vmatpush3.bf16.msra.mxu0 %v1128_v34  ;;  %v1135_v34 = vld [vmem:[%s1459_s5 + $0x38] sm:$0xff]   ;;  %p1139_p13 = pneg %p1138_p12  ;;  %s1140_s9 = sshll.u32 %s1200_s8, 4  ;;  %s1141_s9 = int_to_ptr.vmem [resolvable:$false] %s1140_s9 }
  0x1f   : > { %1048 = vmatprep.subr.bf16.mxu0 %v1129_v35  ;;  %s1142_s13 = scalar_lea.vmem %s1141_s9, 4096  ;;  %p1143_p0 = scmp.lt.s32.totalorder %s1406_s20, %s1141_s9 }
  0x20   : > { %1023 = vmatpush3.bf16.msra.mxu1 %v1124_v15  ;;  %p1144_p1 = scmp.lt.s32.totalorder %s1142_s13, %s1136_s29 }
  0x21   : > { %1024 = vmatprep.subr.bf16.mxu1 %v1125_v20 }
  0x22   : > { %1049 = vmatpush3.bf16.msra.mxu0 %v1129_v35  ;;  %v931_v35 = vld [vmem:[%s1458_s4] ss:$0 sm:$0xff]  ;;  %p1145_p2 = por %p1144_p1, %p1143_p0 }
  0x23   : > { %1050 = vmatprep.subr.bf16.mxu0 %v1130_v36 }
  0x24   : > { %1003 = vmatmul.mubr.msk.bf16.gmra.mrb[4].mxu0 %vm313_vm1, %v300_v21  ;;  %1025 = vmatpush3.bf16.msra.mxu1 %v1125_v20  ;;  %p1146_p3 = pnand %p1145_p2, %p1139_p13 }
  0x25   : > { %1006 = vmatprep.mubr.msk.bf16.mxu0 %vm313_vm1, %v301_v22  ;;  %1026 = vmatprep.subr.bf16.mxu1 %v1126_v32 }
  0x26   : > { %1051 = vmatpush3.bf16.msra.mxu0 %v1130_v36 }
  0x27   : > { %1052 = vmatprep.subr.bf16.mxu0 %v1131_v37 }
  0x28   : > { %1027 = vmatpush3.bf16.msra.mxu1 %v1126_v32 }
  0x29   : > { %1028 = vmatprep.subr.bf16.mxu1 %v1127_v33 }
  0x2a   : > { %1053 = vmatpush3.bf16.msra.mxu0 %v1131_v37 }
  0x2b   : > { %1054 = vmatprep.subr.bf16.mxu0 %v1132_v38 }
  0x2c   : > { %1007 = vmatmul.mubr.msk.bf16.gmra.mrb[8].mxu0 %vm313_vm1, %v302_v27  ;;  %1029 = vmatpush3.bf16.msra.mxu1 %v1127_v33  ;;  %v1134_v33 = vld [vmem:[%s1459_s5 + $0x30] sm:$0xff]  }
  0x2d   : > { %1010 = vmatprep.mubr.msk.bf16.mxu0 %vm313_vm1, %v303_v28 }
  0x2e   : > { %1055 = vmatpush3.bf16.msra.mxu0 %v1132_v38 }
  0x2f   : > { %1056 = vmatprep.subr.bf16.mxu0 %v1133_v39 }
  0x32   : > { %1057 = vmatpush3.bf16.msra.mxu0 %v1133_v39 }
  0x33   : > { %1058 = vmatprep.subr.bf16.mxu0 %v1134_v33 }
  0x34   : > { %1011 = vmatmul.mubr.msk.bf16.gmra.mrb[12].mxu0 %vm313_vm1, %v304_v31 }
  0x36   : > { %1059 = vmatpush3.bf16.msra.mxu0 %v1134_v33 }
  0x37   : > { %1060 = vmatprep.subr.bf16.mxu0 %v1135_v34 }
  0x3a   : > { %1061 = vmatpush3.bf16.msra.mxu0 %v1135_v34 }
  0xef   : > { %v1000_v41 = vpop.f32.mrb[0].mxu0 }
  0xf0   : > { %v385_v42 = vadd.f32 %v1000_v41, %v922_v40  ;;  %v376_v43 = vpop.f32.mrb[1].mxu0 }
  0xf1   : > { %v377_v44 = vadd.f32 %v922_v40, %v376_v43  ;;  %v1001_v45 = vpop.f32.mrb[2].mxu0 }
  0xf2   : > { %v388_v46 = vadd.f32 %v1001_v45, %v922_v40  ;;  %v379_v47 = vpop.f32.mrb[3].mxu0  ;;  %v441_v49 = vmax.f32 %v385_v42, 0.0 }
  0xf3   : > { %v380_v48 = vadd.f32 %v922_v40, %v379_v47  ;;  %v439_v51 = vmax.f32 %v377_v44, 0.0 }
  0xf4   : > { %v442_v50 = vmax.f32 %v388_v46, 0.0 }
  0xf5   : > { %v440_v52 = vmax.f32 %v380_v48, 0.0 }
  0xf6   : > { %v456_v53 = vpack.c.bf16 %v442_v50, %v441_v49 }
  0xf7   : > { %v1004_v54 = vpop.f32.mrb[4].mxu0  ;;  %v455_v55 = vpack.c.bf16 %v440_v52, %v439_v51 }
  0xf8   : > { %v401_v56 = vadd.f32 %v1004_v54, %v922_v40  ;;  %v392_v57 = vpop.f32.mrb[5].mxu0 }
  0xf9   : > { %v393_v58 = vadd.f32 %v922_v40, %v392_v57  ;;  %v1005_v59 = vpop.f32.mrb[6].mxu0  ;;  %1030 = vmatprep.mubr.bf16.mxu1 %v455_v55 }
  0xfa   : > { %v404_v60 = vadd.f32 %v1005_v59, %v922_v40  ;;  %v395_v61 = vpop.f32.mrb[7].mxu0  ;;  %1031 = vmatmul.mubr.bf16.vlgmr.msra.gmra.mrb[0].mxu1 %v456_v53  ;;  %v445_v63 = vmax.f32 %v401_v56, 0.0 }
  0xfb   : > { %v396_v62 = vadd.f32 %v922_v40, %v395_v61  ;;  %v443_v1 = vmax.f32 %v393_v58, 0.0 }
  0xfc   : > { %v446_v0 = vmax.f32 %v404_v60, 0.0 }
  0xfd   : > { %v444_v2 = vmax.f32 %v396_v62, 0.0 }
  0xfe   : > { %v458_v3 = vpack.c.bf16 %v446_v0, %v445_v63 }
  0xff   : > { %v457_v4 = vpack.c.bf16 %v444_v2, %v443_v1  ;;  %v1008_v5 = vpop.f32.mrb[8].mxu0 }
 0x100   : > { %v417_v6 = vadd.f32 %v1008_v5, %v922_v40  ;;  %v408_v7 = vpop.f32.mrb[9].mxu0 }
 0x101   : > { %v409_v8 = vadd.f32 %v922_v40, %v408_v7  ;;  %v1009_v9 = vpop.f32.mrb[10].mxu0  ;;  %1034 = vmatprep.mubr.bf16.mxu1 %v457_v4 }
 0x102   : > { %v420_v10 = vadd.f32 %v1009_v9, %v922_v40  ;;  %v411_v11 = vpop.f32.mrb[11].mxu0  ;;  %1035 = vmatmul.mubr.bf16.gmra.mrb[4].mxu1 %v458_v3  ;;  %v449_v13 = vmax.f32 %v417_v6, 0.0 }
 0x103   : > { %v412_v12 = vadd.f32 %v922_v40, %v411_v11  ;;  %v447_v15 = vmax.f32 %v409_v8, 0.0 }
 0x104   : > { %v450_v14 = vmax.f32 %v420_v10, 0.0 }
 0x105   : > { %v448_v16 = vmax.f32 %v412_v12, 0.0 }
 0x106   : > { %v460_v17 = vpack.c.bf16 %v450_v14, %v449_v13 }
 0x107   : > { %v459_v18 = vpack.c.bf16 %v448_v16, %v447_v15  ;;  %v1012_v19 = vpop.f32.mrb[12].mxu0 }
 0x108   : > { %v433_v20 = vadd.f32 %v1012_v19, %v922_v40  ;;  %v424_v21 = vpop.f32.mrb[13].mxu0 }
 0x109   : > { %v425_v22 = vadd.f32 %v922_v40, %v424_v21  ;;  %v1013_v23 = vpop.f32.mrb[14].mxu0  ;;  %1038 = vmatprep.mubr.bf16.mxu1 %v459_v18 }
 0x10a   : > { %v436_v24 = vadd.f32 %v1013_v23, %v922_v40  ;;  %v427_v25 = vpop.f32.mrb[15].mxu0  ;;  %1039 = vmatmul.mubr.bf16.gmra.mrb[8].mxu1 %v460_v17  ;;  %v453_v27 = vmax.f32 %v433_v20, 0.0 }
 0x10b   : > { %v428_v26 = vadd.f32 %v922_v40, %v427_v25  ;;  %v451_v29 = vmax.f32 %v425_v22, 0.0 }
 0x10c   : > { %v454_v28 = vmax.f32 %v436_v24, 0.0 }
 0x10d   : > { %v452_v30 = vmax.f32 %v428_v26, 0.0 }
 0x10e   : > { %v462_v31 = vpack.c.bf16 %v454_v28, %v453_v27  ;;  %v940_v28 = vld [vmem:[%s1460_s6] ss:$0 sm:$0xff] }
 0x10f   : > { %v461_v32 = vpack.c.bf16 %v452_v30, %v451_v29 }
 0x111   : > { %1042 = vmatprep.mubr.bf16.mxu1 %v461_v32 }
 0x112   : > { %1043 = vmatmul.mubr.bf16.gmra.mrb[12].mxu1 %v462_v31 }
 0x1cd   : > { %v1032_v36 = vpop.f32.mrb[0].mxu1 }
 0x1ce   : > { %v577_v37 = vadd.f32 %v1032_v36, %v931_v35  ;;  %v568_v38 = vpop.f32.mrb[1].mxu1 }
 0x1cf   : > { %v569_v39 = vadd.f32 %v931_v35, %v568_v38  ;;  %v1033_v40 = vpop.f32.mrb[2].mxu1 }
 0x1d0   : > { %v580_v41 = vadd.f32 %v1033_v40, %v931_v35  ;;  %v571_v42 = vpop.f32.mrb[3].mxu1  ;;  %v633_v44 = vmax.f32 %v577_v37, 0.0 }
 0x1d1   : > { %v572_v43 = vadd.f32 %v931_v35, %v571_v42  ;;  %v631_v46 = vmax.f32 %v569_v39, 0.0 }
 0x1d2   : > { %v634_v45 = vmax.f32 %v580_v41, 0.0 }
 0x1d3   : > { %v632_v47 = vmax.f32 %v572_v43, 0.0 }
 0x1d4   : > { %v648_v48 = vpack.c.bf16 %v634_v45, %v633_v44 }
 0x1d5   : > { %v647_v49 = vpack.c.bf16 %v632_v47, %v631_v46  ;;  %v1036_v50 = vpop.f32.mrb[4].mxu1 }
 0x1d6   : > { %v593_v51 = vadd.f32 %v1036_v50, %v931_v35  ;;  %v584_v52 = vpop.f32.mrb[5].mxu1 }
 0x1d7   : > { %v585_v53 = vadd.f32 %v931_v35, %v584_v52  ;;  %v1037_v54 = vpop.f32.mrb[6].mxu1  ;;  %1062 = vmatprep.mubr.bf16.mxu0 %v647_v49 }
 0x1d8   : > { %v596_v55 = vadd.f32 %v1037_v54, %v931_v35  ;;  %v587_v56 = vpop.f32.mrb[7].mxu1  ;;  %1063 = vmatmul.mubr.bf16.vlgmr.msra.gmra.mrb[16].mxu0 %v648_v48  ;;  %v637_v58 = vmax.f32 %v593_v51, 0.0 }
 0x1d9   : > { %v588_v57 = vadd.f32 %v931_v35, %v587_v56  ;;  %v635_v60 = vmax.f32 %v585_v53, 0.0 }
 0x1da   : > { %v638_v59 = vmax.f32 %v596_v55, 0.0 }
 0x1db   : > { %v636_v61 = vmax.f32 %v588_v57, 0.0 }
 0x1dc   : > { %v650_v62 = vpack.c.bf16 %v638_v59, %v637_v58 }
 0x1dd   : > { %v649_v63 = vpack.c.bf16 %v636_v61, %v635_v60  ;;  %v1040_v0 = vpop.f32.mrb[8].mxu1 }
 0x1de   : > { %v609_v1 = vadd.f32 %v1040_v0, %v931_v35  ;;  %v600_v2 = vpop.f32.mrb[9].mxu1 }
 0x1df   : > { %v601_v3 = vadd.f32 %v931_v35, %v600_v2  ;;  %v1041_v4 = vpop.f32.mrb[10].mxu1  ;;  %1066 = vmatprep.mubr.bf16.mxu0 %v649_v63 }
 0x1e0   : > { %v612_v5 = vadd.f32 %v1041_v4, %v931_v35  ;;  %v603_v6 = vpop.f32.mrb[11].mxu1  ;;  %1067 = vmatmul.mubr.bf16.gmra.mrb[20].mxu0 %v650_v62  ;;  %v641_v8 = vmax.f32 %v609_v1, 0.0 }
 0x1e1   : > { %v604_v7 = vadd.f32 %v931_v35, %v603_v6  ;;  %v639_v10 = vmax.f32 %v601_v3, 0.0 }
 0x1e2   : > { %v642_v9 = vmax.f32 %v612_v5, 0.0 }
 0x1e3   : > { %v640_v11 = vmax.f32 %v604_v7, 0.0 }
 0x1e4   : > { %v652_v12 = vpack.c.bf16 %v642_v9, %v641_v8 }
 0x1e5   : > { %v651_v13 = vpack.c.bf16 %v640_v11, %v639_v10  ;;  %v1044_v14 = vpop.f32.mrb[12].mxu1 }
 0x1e6   : > { %v625_v15 = vadd.f32 %v1044_v14, %v931_v35  ;;  %v616_v16 = vpop.f32.mrb[13].mxu1 }
 0x1e7   : > { %v617_v17 = vadd.f32 %v931_v35, %v616_v16  ;;  %v1045_v18 = vpop.f32.mrb[14].mxu1  ;;  %1070 = vmatprep.mubr.bf16.mxu0 %v651_v13 }
 0x1e8   : > { %v628_v19 = vadd.f32 %v1045_v18, %v931_v35  ;;  %v619_v20 = vpop.f32.mrb[15].mxu1  ;;  %1071 = vmatmul.mubr.bf16.gmra.mrb[24].mxu0 %v652_v12  ;;  %v645_v22 = vmax.f32 %v625_v15, 0.0 }
 0x1e9   : > { %v620_v21 = vadd.f32 %v931_v35, %v619_v20  ;;  %v643_v24 = vmax.f32 %v617_v17, 0.0 }
 0x1ea   : > { %v646_v23 = vmax.f32 %v628_v19, 0.0 }
 0x1eb   : > { %v644_v25 = vmax.f32 %v620_v21, 0.0 }
 0x1ec   : > { %v654_v26 = vpack.c.bf16 %v646_v23, %v645_v22 }
 0x1ed   : > { %v653_v27 = vpack.c.bf16 %v644_v25, %v643_v24 }
 0x1ef   : > { %1074 = vmatprep.mubr.bf16.mxu0 %v653_v27 }
 0x1f0   : > { %1075 = vmatmul.mubr.bf16.gmra.mrb[28].mxu0 %v654_v26 }
 0x2ab   : > { %v1064_v29 = vpop.f32.mrb[16].mxu0 }
 0x2ac   : > { %v769_v30 = vadd.f32 %v1064_v29, %v940_v28  ;;  %v760_v31 = vpop.f32.mrb[17].mxu0 }
 0x2ad   : > { %v761_v32 = vadd.f32 %v940_v28, %v760_v31  ;;  %v1065_v33 = vpop.f32.mrb[18].mxu0 }
 0x2ae   : > { %825 = vst [vmem:[%s1384_s18 + $0x10] sm:$0xff] %v769_v30  ;;  %v772_v34 = vadd.f32 %v1065_v33, %v940_v28  ;;  %v763_v35 = vpop.f32.mrb[19].mxu0 }
 0x2af   : > { %823 = vst [vmem:[%s1384_s18] sm:$0xff] %v761_v32  ;;  %v764_v36 = vadd.f32 %v940_v28, %v763_v35 }
 0x2b0   : > { %826 = vst [vmem:[%s1384_s18 + $0x18] sm:$0xff] %v772_v34 }
 0x2b1   : > { %824 = vst [vmem:[%s1384_s18 + $0x8] sm:$0xff] %v764_v36 }
 0x2b3   : > { %v1068_v37 = vpop.f32.mrb[20].mxu0 }
 0x2b4   : > { %v785_v38 = vadd.f32 %v1068_v37, %v940_v28  ;;  %v776_v39 = vpop.f32.mrb[21].mxu0 }
 0x2b5   : > { %v777_v40 = vadd.f32 %v940_v28, %v776_v39  ;;  %v1069_v41 = vpop.f32.mrb[22].mxu0 }
 0x2b6   : > { %829 = vst [vmem:[%s1384_s18 + $0x30] sm:$0xff] %v785_v38  ;;  %v788_v42 = vadd.f32 %v1069_v41, %v940_v28  ;;  %v779_v43 = vpop.f32.mrb[23].mxu0 }
 0x2b7   : > { %827 = vst [vmem:[%s1384_s18 + $0x20] sm:$0xff] %v777_v40  ;;  %v780_v44 = vadd.f32 %v940_v28, %v779_v43 }
 0x2b8   : > { %830 = vst [vmem:[%s1384_s18 + $0x38] sm:$0xff] %v788_v42 }
 0x2b9   : > { %828 = vst [vmem:[%s1384_s18 + $0x28] sm:$0xff] %v780_v44 }
 0x2bb   : > { %v1072_v45 = vpop.f32.mrb[24].mxu0 }
 0x2bc   : > { %v801_v46 = vadd.f32 %v1072_v45, %v940_v28  ;;  %v792_v47 = vpop.f32.mrb[25].mxu0 }
 0x2bd   : > { %v793_v48 = vadd.f32 %v940_v28, %v792_v47  ;;  %v1073_v49 = vpop.f32.mrb[26].mxu0 }
 0x2be   : > { %833 = vst [vmem:[%s1384_s18 + $0x50] sm:$0xff] %v801_v46  ;;  %v804_v50 = vadd.f32 %v1073_v49, %v940_v28  ;;  %v795_v51 = vpop.f32.mrb[27].mxu0 }
 0x2bf   : > { %831 = vst [vmem:[%s1384_s18 + $0x40] sm:$0xff] %v793_v48  ;;  %v796_v52 = vadd.f32 %v940_v28, %v795_v51 }
 0x2c0   : > { %834 = vst [vmem:[%s1384_s18 + $0x58] sm:$0xff] %v804_v50 }
 0x2c1   : > { %832 = vst [vmem:[%s1384_s18 + $0x48] sm:$0xff] %v796_v52 }
 0x2c3   : > { %v1076_v53 = vpop.f32.mrb[28].mxu0 }
 0x2c4   : > { %v817_v54 = vadd.f32 %v1076_v53, %v940_v28  ;;  %v808_v55 = vpop.f32.mrb[29].mxu0 }
 0x2c5   : > { %v809_v56 = vadd.f32 %v940_v28, %v808_v55  ;;  %v1077_v57 = vpop.f32.mrb[30].mxu0 }
 0x2c6   : > { %837 = vst [vmem:[%s1384_s18 + $0x70] sm:$0xff] %v817_v54  ;;  %v820_v58 = vadd.f32 %v1077_v57, %v940_v28  ;;  %v811_v59 = vpop.f32.mrb[31].mxu0 }
 0x2c7   : > { %835 = vst [vmem:[%s1384_s18 + $0x60] sm:$0xff] %v809_v56  ;;  %v812_v60 = vadd.f32 %v940_v28, %v811_v59 }
 0x2c8   : > { %838 = vst [vmem:[%s1384_s18 + $0x78] sm:$0xff] %v820_v58 }
 0x2c9   : > { %836 = vst [vmem:[%s1384_s18 + $0x68] sm:$0xff] %v812_v60 }
 0x2ca   : > { %1149 = shalt.err (!%p1146_p3)
}
 0x2cb   : > { %s1150_s14 = scalar_lea.hbm %s1404_s23, 2048  ;;  %s1154_s17 = scalar_lea.hbm %s1461_s7, 4096 }
 0x2cc   : > { %p1151_p4 = scmp.ne.s32.totalorder %s1404_s23, %s1150_s14  ;;  %p1155_p9 = scmp.lt.u32.totalorder %s1404_s23, %s1461_s7 }
 0x2cd   : > { %p1156_p10 = scmp.lt.u32.totalorder %s1154_s17, %s1150_s14  ;;  %p1158_p12 = scmp.lt.u32.totalorder %s1150_s14, %s1404_s23 }
 0x2ce   : > { %p1152_p7 = pnand %p1151_p4, %p1281_p5 }
 0x2cf   : > { %p1157_p11 = por %p1156_p10, %p1155_p9 }
 0x2d0   : > { %p1153_p8 = pneg %p1152_p7 }
 0x2d1   : > { %p1159_p13 = por %p1158_p12, %p1157_p11 }
 0x2d3   : > { %p1160_p0 = pnand %p1159_p13, %p1153_p8 }
 0x2d5   : > { %1163 = shalt.err (!%p1160_p0)
}
 0x2d6   : > { %s1201_s21 = smov 128   ;;  %s1202_s22 = smov 8  }
 0x2d7   : > { %1079 = dma.vmem_to_hbm [thread:$0]  (%p1281_p5), %s1406_s20, 2048, %s1404_s23, %s1413_s28, %s1201_s21, %s1201_s21, %s1202_s22  }
 0x2d8 PF: > { %p1085_p1 = scmp.ge.s32.totalorder %s1198_s27, 2  ;;  %s868_s29 = sand.u32 1, %s1186_s24  }
 0x2d9   : > { %s869_s8 = scalar_lea.sflag [#allocation3], %s868_s29 }
 0x2da   : > { %p1082_p2 = pnand %p1085_p1, %p1285_p6 }
 0x2dc   : > { %1181 = dma.done.wait (!%p1082_p2), %s869_s8, 2048  }
 0x2dd   : > { %1183 = vsyncadd (!%p1082_p2), %s869_s8, 4294965248  ;;  %p17_p3 = scmp.ge.s32.totalorder %s1268_s30, 4   ;;  %s1464_s24 = smov %s1190_s25 }
 0x2de   : > { %s1465_s25 = smov %s1194_s26  ;;  %s1466_s26 = smov %s1279_s10 }
 0x2df   : > { %s1467_s27 = smov %s1268_s30  ;;  %19 = sbr.rel (!%p17_p3) target bundleno = 3 (0x3), region = 83 }
 0x2e6   :  { %874 = vsyncpa [#allocation3], 1 }
 0x2e7   :  { %876 = vsyncpa [#allocation3 + $0x1], 1 }

</bundles_post_ra>
